<compile_context>
chip_gen: v7x
topology: tpu7x:2x2x1
jax: 0.10.0
libtpu: 0.0.40
codegen_flags: <defaults>
</compile_context>

<pallas_src>
import functools
import math

import jax
import jax.numpy as jnp
from jax import lax
from jax.experimental import pallas as pl
from jax.experimental.pallas import tpu as pltpu


def _round_up(x, m):
    return ((x + m - 1) // m) * m


def _erf(x):
    """Abramowitz & Stegun 7.1.26 erf approximation (|error| < ~1.5e-7).

    Built from exp / mul / add / abs / where / EUP reciprocal so it always
    lowers in Mosaic. The divide uses the approx EUP reciprocal (its own VLIW
    slot, essentially free) plus one Newton-Raphson refinement step to keep
    full f32 accuracy.
    """
    a1, a2, a3, a4, a5 = (0.254829592, -0.284496736, 1.421413741,
                          -1.453152027, 1.061405429)
    p = 0.3275911
    ax = jnp.abs(x)
    d = 1.0 + p * ax
    t = pl.reciprocal(d, approx=True)
    t = t * (2.0 - d * t)                       # one Newton step -> ~f32 exact
    poly = ((((a5 * t + a4) * t + a3) * t + a2) * t + a1) * t
    y = 1.0 - poly * jnp.exp(-ax * ax)
    return jnp.where(x >= 0, y, -y)


def _gelu_exact(x):
    # erf-based GELU, matching HF ACT2FN["gelu"].
    return 0.5 * x * (1.0 + _erf(x * (1.0 / math.sqrt(2.0))))


def _gelu_tanh(x):
    return jax.nn.gelu(x, approximate=True)


_ACT2FN = {
    "gelu": _gelu_exact,
    "gelu_new": _gelu_tanh,
    "gelu_pytorch_tanh": _gelu_tanh,
    "relu": jax.nn.relu,
    "silu": jax.nn.silu,
    "swish": jax.nn.silu,
    "tanh": jnp.tanh,
}


def _head_transform_kernel(x_ref, w_ref, g_ref, o_ref, *, eps, act_fn):
    """Fused dense(no bias) + activation + RMSNorm on one (TB, H) token tile.

    x_ref : VMEM (TB, H)   activation tile (streamed per grid step), native dtype
    w_ref : VMEM (H,  H)   dense weight, pre-transposed to (in, out); resident
    g_ref : VMEM (1,  H)   RMSNorm gamma (f32); resident
    o_ref : VMEM (TB, H)   output tile
    """
    # MXU matmul in native operand dtype, f32 accumulator.
    y = jnp.dot(x_ref[...], w_ref[...], preferred_element_type=jnp.float32)
    # Activation + RMSNorm epilogue entirely in f32 (matches the PyTorch
    # RMSNorm, which upcasts to f32 before the variance).
    y = act_fn(y)
    var = jnp.mean(y * y, axis=-1, keepdims=True)   # XLU cross-lane reduce: free
    y = y * lax.rsqrt(var + eps)
    o_ref[...] = (g_ref[...] * y).astype(o_ref.dtype)


def diffbert_prediction_head_transform(hidden_states, dense_weight, rms_weight,
                                       *, hidden_act="gelu", eps=1e-6,
                                       token_block=512, matmul_dtype=None):
    """JAX/Pallas equivalent of DiffBertPredictionHeadTransform.forward.

    hidden_states: (..., H)
    dense_weight : (H_out, H_in)   PyTorch nn.Linear weight layout
    rms_weight   : (H,)            RMSNorm gamma
    matmul_dtype : optional dtype for the MXU matmul operands (e.g.
                   jnp.bfloat16 for the single-pass MXU fast path); defaults
                   to the input's native dtype (semantics-preserving).
    """
    act_fn = _ACT2FN[hidden_act] if isinstance(hidden_act, str) else hidden_act

    orig_shape = hidden_states.shape
    H = orig_shape[-1]
    x = hidden_states.reshape(-1, H)
    n = x.shape[0]

    # Token-block tiling (sublane dim must be a multiple of 8). No padding:
    # the ragged last block is handled by Pallas (masked stores); junk rows
    # only affect junk rows because every op is row-independent.
    tb = max(8, min(token_block, _round_up(n, 8)))
    if n > 8 and pl.cdiv(n, tb) < 2:
        # Short input: split into >=2 grid steps so both v7x cores get work.
        tb = _round_up(pl.cdiv(n, 2), 8)
    grid = (pl.cdiv(n, tb),)

    # One-time host-side prep: transpose the Linear weight to (in, out) and
    # cast the matmul operands to the requested dtype; gamma is kept in f32
    # for the f32 epilogue.
    mm_dtype = jnp.dtype(matmul_dtype) if matmul_dtype is not None else x.dtype
    w_in_out = dense_weight.T.astype(mm_dtype)
    if x.dtype != mm_dtype:
        x = x.astype(mm_dtype)
    gamma = rms_weight.reshape(1, H).astype(jnp.float32)

    # VMEM budget: single-buffered weight + double-buffered in/out tiles +
    # f32 epilogue temporaries, with 2x headroom (floor 32 MiB, cap 128 MiB).
    x_bytes = x.dtype.itemsize
    o_bytes = jnp.dtype(hidden_states.dtype).itemsize
    w_bytes = w_in_out.dtype.itemsize
    vmem_estimate = (H * H * w_bytes
                     + 2 * tb * H * x_bytes
                     + 2 * tb * H * o_bytes
                     + 6 * tb * H * 4
                     + (1 << 20))
    vmem_limit = int(min(128 << 20, max(32 << 20, 2 * vmem_estimate)))

    cost = pl.CostEstimate(
        flops=2 * n * H * H + 12 * n * H,       # matmul + GELU/RMSNorm epilogue
        transcendentals=2 * n * H,              # exp (gelu) + rsqrt/rcp
        bytes_accessed=n * H * (x_bytes + o_bytes) + H * H * w_bytes + H * 4,
    )

    kernel = functools.partial(_head_transform_kernel, eps=eps, act_fn=act_fn)

    out = pl.pallas_call(
        kernel,
        out_shape=jax.ShapeDtypeStruct((n, H), hidden_states.dtype),
        grid=grid,
        in_specs=[
            # activations: streamed, default double-buffered
            pl.BlockSpec((tb, H), lambda t: (t, 0)),
            # dense weight: resident & single-buffered (never re-fetched)
            pl.BlockSpec((H, H), lambda t: (0, 0),
                         pipeline_mode=pl.Buffered(1)),
            # RMSNorm gamma: resident & single-buffered
            pl.BlockSpec((1, H), lambda t: (0, 0),
                         pipeline_mode=pl.Buffered(1)),
        ],
        out_specs=pl.BlockSpec((tb, H), lambda t: (t, 0)),
        compiler_params=pltpu.CompilerParams(
            dimension_semantics=("parallel",),   # shard token blocks over TCs
            vmem_limit_bytes=vmem_limit),
        cost_estimate=cost,
    )(x, w_in_out, gamma)

    return out.reshape(orig_shape)


if __name__ == "__main__":
    # Small shapes consistent with the module: batch=2, seq=8, hidden=32.
    batch, seq, hidden = 2, 8, 32
    eps = 1e-6

    key = jax.random.PRNGKey(0)
    k_x, k_w, k_g = jax.random.split(key, 3)
    hidden_states = jax.random.normal(k_x, (batch, seq, hidden), jnp.float32)
    dense_weight = 0.05 * jax.random.normal(k_w, (hidden, hidden), jnp.float32)
    rms_weight = 1.0 + 0.1 * jax.random.normal(k_g, (hidden,), jnp.float32)

    out = diffbert_prediction_head_transform(
        hidden_states, dense_weight, rms_weight, hidden_act="gelu", eps=eps)
    out = jax.block_until_ready(out)

    # Pure-JAX reference of the PyTorch forward (exact erf GELU, f32 RMSNorm).
    xf = hidden_states.reshape(-1, hidden).astype(jnp.float32)
    y = jnp.dot(xf, dense_weight.T, precision=lax.Precision.HIGHEST)
    y = jax.nn.gelu(y, approximate=False)
    var = jnp.mean(y * y, axis=-1, keepdims=True)
    ref = (rms_weight * (y * lax.rsqrt(var + eps))).reshape(batch, seq, hidden)

    assert out.shape == (batch, seq, hidden)
    # Tolerance covers MXU f32-matmul pass-count differences vs XLA HIGHEST.
    assert jnp.allclose(out, ref, atol=2e-2, rtol=2e-2), (
        "mismatch vs reference, max abs diff = "
        f"{float(jnp.max(jnp.abs(out - ref)))}")

    print("KERNEL_OK")
</pallas_src>

<mosaic_0001>
module attributes {stable_mosaic.version = 11 : i64} {
  func.func @_head_transform_kernel(%arg0: i32, %arg1: memref<8x32xf32, #tpu.memory_space<vmem>>, %arg2: memref<32x32xf32, #tpu.memory_space<vmem>>, %arg3: memref<1x32xf32, #tpu.memory_space<vmem>>, %arg4: memref<8x32xf32, #tpu.memory_space<vmem>>) attributes {dimension_semantics = [#tpu.dimension_semantics<parallel>], iteration_bounds = array<i64: 2>, scalar_prefetch = 0 : i64, scratch_operands = 0 : i64, tpu.core_type = #tpu.core_type<tc>, window_params = [{transform_indices = @transform_0, window_bounds = array<i64: 8, 32>}, {pipeline_mode = #tpu.pipeline_mode<synchronous>, transform_indices = @transform_1, window_bounds = array<i64: 32, 32>}, {pipeline_mode = #tpu.pipeline_mode<synchronous>, transform_indices = @transform_2, window_bounds = array<i64: 1, 32>}, {transform_indices = @transform_3, window_bounds = array<i64: 8, 32>}]} {
    %c0 = arith.constant 0 : index
    %c0_0 = arith.constant 0 : index
    %0 = vector.load %arg1[%c0, %c0_0] : memref<8x32xf32, #tpu.memory_space<vmem>>, vector<8x32xf32>
    %c0_1 = arith.constant 0 : index
    %c0_2 = arith.constant 0 : index
    %1 = vector.load %arg2[%c0_1, %c0_2] : memref<32x32xf32, #tpu.memory_space<vmem>>, vector<32x32xf32>
    %cst = arith.constant dense<0.000000e+00> : vector<8x32xf32>
    %2 = tpu.matmul %0, %1, %cst {dimension_numbers = #tpu.dot_dimension_numbers<[1], [0], [0], [1], [0, 0, 1, 1], [], []>} : vector<8x32xf32>, vector<32x32xf32>, vector<8x32xf32> -> vector<8x32xf32>
    %cst_3 = arith.constant 5.000000e-01 : f32
    %3 = vector.broadcast %cst_3 : f32 to vector<8x32xf32>
    %4 = arith.mulf %3, %2 : vector<8x32xf32>
    %cst_4 = arith.constant 0.707106769 : f32
    %5 = vector.broadcast %cst_4 : f32 to vector<8x32xf32>
    %6 = arith.mulf %2, %5 : vector<8x32xf32>
    %7 = math.absf %6 : vector<8x32xf32>
    %cst_5 = arith.constant 0.327591091 : f32
    %8 = vector.broadcast %cst_5 : f32 to vector<8x32xf32>
    %9 = arith.mulf %8, %7 : vector<8x32xf32>
    %cst_6 = arith.constant 1.000000e+00 : f32
    %10 = vector.broadcast %cst_6 : f32 to vector<8x32xf32>
    %11 = arith.addf %10, %9 : vector<8x32xf32>
    %12 = tpu.reciprocal %11 {approx = true} : vector<8x32xf32> -> vector<8x32xf32>
    %13 = arith.mulf %11, %12 : vector<8x32xf32>
    %cst_7 = arith.constant 2.000000e+00 : f32
    %14 = vector.broadcast %cst_7 : f32 to vector<8x32xf32>
    %15 = arith.subf %14, %13 : vector<8x32xf32>
    %16 = arith.mulf %12, %15 : vector<8x32xf32>
    %cst_8 = arith.constant 1.06140542 : f32
    %17 = vector.broadcast %cst_8 : f32 to vector<8x32xf32>
    %18 = arith.mulf %17, %16 : vector<8x32xf32>
    %cst_9 = arith.constant -1.45315206 : f32
    %19 = vector.broadcast %cst_9 : f32 to vector<8x32xf32>
    %20 = arith.addf %18, %19 : vector<8x32xf32>
    %21 = arith.mulf %20, %16 : vector<8x32xf32>
    %cst_10 = arith.constant 1.42141378 : f32
    %22 = vector.broadcast %cst_10 : f32 to vector<8x32xf32>
    %23 = arith.addf %21, %22 : vector<8x32xf32>
    %24 = arith.mulf %23, %16 : vector<8x32xf32>
    %cst_11 = arith.constant -0.284496725 : f32
    %25 = vector.broadcast %cst_11 : f32 to vector<8x32xf32>
    %26 = arith.addf %24, %25 : vector<8x32xf32>
    %27 = arith.mulf %26, %16 : vector<8x32xf32>
    %cst_12 = arith.constant 0.254829586 : f32
    %28 = vector.broadcast %cst_12 : f32 to vector<8x32xf32>
    %29 = arith.addf %27, %28 : vector<8x32xf32>
    %30 = arith.mulf %29, %16 : vector<8x32xf32>
    %cst_13 = arith.constant 0.000000e+00 : f32
    %31 = vector.broadcast %cst_13 : f32 to vector<8x32xf32>
    %32 = arith.subf %31, %7 : vector<8x32xf32>
    %33 = arith.mulf %32, %7 : vector<8x32xf32>
    %34 = math.exp %33 : vector<8x32xf32>
    %35 = arith.mulf %30, %34 : vector<8x32xf32>
    %cst_14 = arith.constant 1.000000e+00 : f32
    %36 = vector.broadcast %cst_14 : f32 to vector<8x32xf32>
    %37 = arith.subf %36, %35 : vector<8x32xf32>
    %cst_15 = arith.constant 0.000000e+00 : f32
    %38 = vector.broadcast %cst_15 : f32 to vector<8x32xf32>
    %39 = arith.cmpf oge, %6, %38 : vector<8x32xf32>
    %cst_16 = arith.constant 0.000000e+00 : f32
    %40 = vector.broadcast %cst_16 : f32 to vector<8x32xf32>
    %41 = arith.subf %40, %37 : vector<8x32xf32>
    %42 = arith.select %39, %37, %41 : vector<8x32xi1>, vector<8x32xf32>
    %cst_17 = arith.constant 1.000000e+00 : f32
    %43 = vector.broadcast %cst_17 : f32 to vector<8x32xf32>
    %44 = arith.addf %43, %42 : vector<8x32xf32>
    %45 = arith.mulf %4, %44 : vector<8x32xf32>
    %46 = arith.mulf %45, %45 : vector<8x32xf32>
    %cst_18 = arith.constant dense<0.000000e+00> : vector<8xf32>
    %47 = vector.multi_reduction <add>, %46, %cst_18 [1] : vector<8x32xf32> to vector<8xf32>
    %48 = vector.shape_cast %47 : vector<8xf32> to vector<8x1xf32>
    %cst_19 = arith.constant 3.200000e+01 : f32
    %49 = vector.broadcast %cst_19 : f32 to vector<8x1xf32>
    %50 = arith.divf %48, %49 : vector<8x1xf32>
    %cst_20 = arith.constant 9.99999997E-7 : f32
    %51 = vector.broadcast %cst_20 : f32 to vector<8x1xf32>
    %52 = arith.addf %50, %51 : vector<8x1xf32>
    %53 = math.rsqrt %52 : vector<8x1xf32>
    %54 = vector.broadcast %53 : vector<8x1xf32> to vector<8x32xf32>
    %55 = arith.mulf %45, %54 : vector<8x32xf32>
    %c0_21 = arith.constant 0 : index
    %c0_22 = arith.constant 0 : index
    %56 = vector.load %arg3[%c0_21, %c0_22] : memref<1x32xf32, #tpu.memory_space<vmem>>, vector<1x32xf32>
    %57 = vector.broadcast %56 : vector<1x32xf32> to vector<8x32xf32>
    %58 = arith.mulf %57, %55 : vector<8x32xf32>
    %c0_23 = arith.constant 0 : index
    %c0_24 = arith.constant 0 : index
    %59 = vector.load %arg4[%c0_23, %c0_24] : memref<8x32xf32, #tpu.memory_space<vmem>>, vector<8x32xf32>
    tpu.vector_store %arg4[%c0_23, %c0_24], %58 {strides = array<i32>} : memref<8x32xf32, #tpu.memory_space<vmem>>, vector<8x32xf32>,
    return
  }
  func.func @transform_0(%arg0: i32) -> (i32, i32) {
    %c0_i32 = arith.constant 0 : i32
    %c0_i32_0 = arith.constant 0 : i32
    return %arg0, %c0_i32 : i32, i32
  }
  func.func @transform_1(%arg0: i32) -> (i32, i32) {
    %c0_i32 = arith.constant 0 : i32
    %c0_i32_0 = arith.constant 0 : i32
    %c0_i32_1 = arith.constant 0 : i32
    return %c0_i32, %c0_i32_0 : i32, i32
  }
  func.func @transform_2(%arg0: i32) -> (i32, i32) {
    %c0_i32 = arith.constant 0 : i32
    %c0_i32_0 = arith.constant 0 : i32
    %c0_i32_1 = arith.constant 0 : i32
    return %c0_i32, %c0_i32_0 : i32, i32
  }
  func.func @transform_3(%arg0: i32) -> (i32, i32) {
    %c0_i32 = arith.constant 0 : i32
    %c0_i32_0 = arith.constant 0 : i32
    return %arg0, %c0_i32 : i32, i32
  }
}

</mosaic_0001>

<bundles_post_ra>
// kernel: tpu_custom_call.1
= control target key start
LH: loop header
LB: loop body
LE: loop exit
PB: predicated region body
PF: predicated region fallthrough
CT: control target
= control target key end

     0   :  { %8 = vsyncpa [#allocation3], 0  ;;  %s891_s0 = inlined_call_operand.hbm [shape: f32[16,32], index: 0, kind: input, shape index: {}]   ;;  %s892_s1 = inlined_call_operand.hbm [shape: f32[32,32], index: 1, kind: input, shape index: {}]   ;;  %s893_s2 = inlined_call_operand.vmem [shape: f32[1,32], index: 2, kind: input, shape index: {}]   ;;  %s894_s3 = inlined_call_operand.hbm [shape: f32[16,32], index: 3, kind: output, shape index: {}]  }
   0x1   :  { %10 = vsyncpa [#allocation3 + $0x1], 0 }
   0x2   :  { %11 = vsyncpa [#allocation6], 0 }
   0x3   :  { %12 = vsyncpa [#allocation4], 0 }
   0x4   :  { %14 = vsyncpa [#allocation4 + $0x1], 0  ;;  %s685_s12 = smov 0   ;;  %s687_s13 = smov 0  }
   0x5   :  { %s689_s14 = smov 0   ;;  %s691_s15 = smov 0  }
   0x6 LB: > { %s706_s16 = sadd.s32 4294967295, %s655_s15   ;;  %s421_s17 = sadd.s32 4294967294, %s655_s15   ;;  %s655_s15 = sphi %s691_s15, %s914_s15   ;;  %s651_s14 = sphi %s689_s14, %s913_s14   ;;  %s647_s13 = sphi %s687_s13, %s912_s13   ;;  %s643_s12 = sphi %s685_s12, %s911_s12  }
   0x7   : > { %p40_p0 = scmp.ne.s32.totalorder %s647_s13, %s643_s12  ;;  %p895_p1 = scmp.eq.s32.totalorder %s706_s16, 0 }
   0x8   : > { %p112_p3 = scmp.eq.s32.totalorder %s421_s17, 1  ;;  %p422_p5 = scmp.ge.s32.totalorder %s655_s15, 1 }
   0x9   : > { %p715_p4 = por %p895_p1, %p40_p0  ;;  %p119_p7 = scmp.lt.s32.totalorder %s655_s15, 3 }
   0xa   : > { %p720_p6 = por %p112_p3, %p40_p0  ;;  %s657_s21 = smov [#allocation5]  }
   0xb   : > { %s898_s18 = scalar_select %p715_p4, 1, 0 }
   0xc   : > { %s899_s19 = scalar_select %p720_p6, 1, 0 }
   0xd   : > { %p725_p8 = pnand %p422_p5, %p119_p7  ;;  %s131_s22 = sshll.u32 %s657_s21, 4  ;;  %s729_s22 = int_to_ptr.vmem [resolvable:$true] %s131_s22 }
   0xe   : > { %s741_s24 = sadd.s32 1, %s655_s15   ;;  %s27_s25 = sadd.s32 1, %s651_s14 }
   0xf   : > { %s900_s20 = scalar_select %p725_p8, 1, 0 }
  0x10   : > { %p467_p9 = pneg %p725_p8  ;;  %s24_s26 = ssub.s32 %s655_s15, %s741_s24 }
  0x11   : > { %s527_s29 = scalar_lea.hbm %s892_s1, 512 }
  0x12   : > { %p736_p11 = pnand %p467_p9, %p895_p1  ;;  %p528_p12 = scmp.ne.s32.totalorder %s892_s1, %s527_s29 }
  0x13   : > { %p534_p5 = scmp.lt.u32.totalorder %s527_s29, %s892_s1 }
  0x14   : > { %p529_p13 = pneg %p736_p11 }
  0x16   : > { %p530_p0 = pnand %p529_p13, %p528_p12 }
  0x18   : > { %p531_p3 = pneg %p530_p0 }
  0x1a   : > { %p536_p7 = pnand %p534_p5, %p531_p3 }
  0x1c   : > { %539 = shalt.err (!%p536_p7)
}
  0x1d   : > { %s540_s7 = scalar_lea.vmem %s729_s22, 512  ;;  %p548_p2 = scmp.lt.s32.totalorder %s729_s22, %s729_s22 }
  0x1e   : > { %p541_p9 = scmp.ne.s32.totalorder %s729_s22, %s540_s7  ;;  %p549_p6 = scmp.lt.s32.totalorder %s540_s7, %s540_s7 }
  0x20   : > { %p543_p10 = pnand %p541_p9, %p529_p13  ;;  %p550_p4 = por %p549_p6, %p548_p2 }
  0x22   : > { %p544_p1 = pneg %p543_p10 }
  0x24   : > { %p551_p8 = pnand %p550_p4, %p544_p1 }
  0x26   : > { %554 = shalt.err (!%p551_p8)
}
  0x27   : > { %s658_s8 = smov 128   ;;  %s659_s9 = smov 8  }
  0x28   : > { %470 = dma.hbm_to_vmem [thread:$0]  (!%p736_p11), %s892_s1, 512, %s729_s22, [#allocation6], %s658_s8, %s658_s8, %s659_s9  }
  0x29   : > { %p25_p2 = scmp.eq.s32.totalorder %s24_s26, 0  ;;  %p34_p1 = scmp.ne.s32.totalorder %s651_s14, %s647_s13 }
  0x2a   : > { %p35_p4 = scmp.eq.s32.totalorder %s655_s15, 0  ;;  %p480_p6 = scmp.lt.s32.totalorder %s655_s15, 2 }
  0x2b   : > { %s772_s17 = scalar_select %p25_p2, %s651_s14, %s27_s25  }
  0x2c   : > { %p36_p8 = por %p35_p4, %p34_p1  ;;  %p902_p10 = scmp.eq.s32.totalorder %s706_s16, 1 }
  0x2d   : > { %s148_s27 = sand.u32 1, %s651_s14   ;;  %s426_s28 = sshll.u32 %s655_s15, 7 }
  0x2e   : > { %p776_p12 = por %p902_p10, %p34_p1  ;;  %s425_s29 = sshll.u32 %s148_s27, 3 }
  0x2f   : > { %s785_s4 = scalar_lea.hbm %s891_s0, %s426_s28  ;;  %s152_s22 = scalar_lea.vmem [#allocation2], %s425_s29 }
  0x30   : > { %s159_s25 = sshll.u32 %s152_s22, 4  ;;  %p787_p11 = pnand %p480_p6, %p36_p8  ;;  %s791_s25 = int_to_ptr.vmem [resolvable:$true] %s159_s25 }
  0x31   : > { %s149_s5 = scalar_lea.sflag [#allocation3], %s148_s27  ;;  %s555_s6 = scalar_lea.hbm %s785_s4, 128 }
  0x32   : > { %p556_p13 = scmp.ne.s32.totalorder %s785_s4, %s555_s6  ;;  %p557_p0 = pneg %p787_p11 }
  0x33   : > { %s560_s9 = scalar_lea.hbm %s891_s0, 256  ;;  %p561_p7 = scmp.lt.u32.totalorder %s785_s4, %s891_s0 }
  0x34   : > { %p558_p3 = pnand %p557_p0, %p556_p13  ;;  %p562_p9 = scmp.lt.u32.totalorder %s560_s9, %s555_s6 }
  0x35   : > { %p564_p1 = scmp.lt.u32.totalorder %s555_s6, %s785_s4 }
  0x36   : > { %p559_p5 = pneg %p558_p3  ;;  %p563_p2 = por %p562_p9, %p561_p7 }
  0x38   : > { %p565_p4 = por %p564_p1, %p563_p2 }
  0x3a   : > { %p566_p6 = pnand %p565_p4, %p559_p5 }
  0x3c   : > { %569 = shalt.err (!%p566_p6)
}
  0x3d   : > { %s570_s27 = scalar_lea.vmem %s791_s25, 128  ;;  %s660_s28 = smov [#allocation2]  }
  0x3e   : > { %p571_p8 = scmp.ne.s32.totalorder %s791_s25, %s570_s27  ;;  %s575_s29 = sshll.u32 %s660_s28, 4  ;;  %s576_s29 = int_to_ptr.vmem [resolvable:$false] %s575_s29 }
  0x3f   : > { %s577_s23 = scalar_lea.vmem %s576_s29, 256  ;;  %p578_p3 = scmp.lt.s32.totalorder %s791_s25, %s576_s29 }
  0x40   : > { %p573_p10 = pnand %p571_p8, %p557_p0  ;;  %p579_p7 = scmp.lt.s32.totalorder %s577_s23, %s570_s27 }
  0x42   : > { %p574_p13 = pneg %p573_p10  ;;  %p580_p9 = por %p579_p7, %p578_p3 }
  0x44   : > { %p581_p2 = pnand %p580_p9, %p574_p13 }
  0x46   : > { %584 = shalt.err (!%p581_p2)
}
  0x47   : > { %474 = dma.hbm_to_vmem [thread:$0]  (!%p787_p11), %s785_s4, 128, %s791_s25, %s149_s5  }
  0x48   : > { %p905_p5 = scmp.ne.s32.totalorder %s900_s20, 0 }
  0x49   : > { %s821_s30 = sand.u32 (!%p905_p5), 1, %s647_s13   ;;  %p906_p0 = scmp.ne.s32.totalorder (!%p905_p5), %s898_s18, 0 }
  0x4a   : > { %168 = sbr.rel (%p905_p5) target bundleno = 539 (0x21b), region = 32  ;;  %s428_s22 = sshll.u32 (!%p905_p5), %s821_s30, 3 }
  0x4b   : > { %s171_s6 = scalar_lea.sflag (!%p905_p5), [#allocation3], %s821_s30  ;;  %s174_s7 = scalar_lea.vmem (!%p905_p5), [#allocation2], %s428_s22 }
  0x51   : > { %630 = dma.done.wait (%p906_p0), %s171_s6, 128  }
  0x52   : > { %632 = vsyncadd (%p906_p0), %s171_s6, 4294967168  ;;  %p907_p11 = scmp.eq.s32.totalorder %s706_s16, 0 }
  0x54   : > { %634 = dma.done.wait (%p907_p11), [#allocation6], 512   ;;  %p908_p1 = pmov %p907_p11 }
  0x55   : > { %v661_v0 = vmov 0.0|0.0   ;;  %vm662_vm0 = vmmov 0   ;;  %v663_v1 = vmov 0.0   ;;  %v202_v2 = vld [vmem:[#allocation5] sm:$0xff]  ;;  %v203_v3 = vld [vmem:[#allocation5 + $0x8] sm:$0xff]  ;;  %v204_v4 = vld [vmem:[#allocation5 + $0x10] sm:$0xff] }
  0x56   : > { %636 = vsyncadd (%p908_p1), [#allocation6], 4294966784  ;;  %453 = vmatprep.subr.bf16.mxu0 %v661_v0  ;;  %450 = vmatprep.mubr.msk.f32.mxu0 %vm662_vm0, %v663_v1  ;;  %v454_v5 = vpack.c.bf16 %v203_v3, %v202_v2  ;;  %v205_v6 = vld [vmem:[#allocation5 + $0x18] sm:$0xff]  ;;  %vm206_vm1 = vcmask 261120   ;;  %v432_v45 = vld [vmem:[%s893_s2] ss:$0 sm:$0xff] }
  0x57   : > { %v457_v7 = vpack.c.bf16 %v205_v6, %v204_v4  ;;  %v201_v8 = vld [vmem:[%s174_s7] sm:$0xff]  ;;  %s434_s4 = sshll.u32 %s706_s16, 7  ;;  %s200_s25 = scalar_lea.vmem [#allocation7], %s428_s22 }
  0x58   : > { %455 = vmatpush3.bf16.msra.mxu0 %v454_v5  ;;  %s341_s26 = sshll.u32 %s200_s25, 4  ;;  %s846_s9 = scalar_lea.hbm %s894_s3, %s434_s4  ;;  %s848_s26 = int_to_ptr.vmem [resolvable:$true] %s341_s26 }
  0x59   : > { %456 = vmatprep.subr.bf16.mxu0 %v661_v0  ;;  %s328_s10 = scalar_lea.sflag [#allocation4], %s821_s30  ;;  %s585_s11 = scalar_lea.vmem %s848_s26, 128 }
  0x5a   : > { %p586_p4 = scmp.ne.s32.totalorder %s848_s26, %s585_s11  ;;  %s664_s16 = smov [#allocation7]  }
  0x5b   : > { %s589_s27 = sshll.u32 %s664_s16, 4  ;;  %s590_s27 = int_to_ptr.vmem [resolvable:$false] %s589_s27 }
  0x5c   : > { %458 = vmatpush3.bf16.msra.mxu0 %v457_v7  ;;  %p587_p6 = pnand %p586_p4, %p776_p12  ;;  %s591_s28 = scalar_lea.vmem %s590_s27, 256 }
  0x5d   : > { %p592_p10 = scmp.lt.s32.totalorder %s848_s26, %s590_s27  ;;  %p593_p13 = scmp.lt.s32.totalorder %s591_s28, %s585_s11 }
  0x5e   : > { %p588_p8 = pneg %p587_p6 }
  0x5f   : > { %451 = vmatmul.mubr.msk.f32.vlgmr.msra.gmra.mrb[0].mxu0 %vm206_vm1, %v201_v8  ;;  %p594_p3 = por %p593_p13, %p592_p10 }
  0x61   : > { %p595_p7 = pnand %p594_p3, %p588_p8 }
 0x132   : > { %v276_v9 = vpop.f32.mrb[0].mxu0 }
 0x133   : > { %v281_v10 = vmul.f32 0.70710677, %v276_v9  ;;  %v452_v11 = vpop.f32.mrb[1].mxu0  ;;  %v280_v36 = vmul.f32 0.5, %v276_v9 }
 0x135   : > { %v282_v12 = vand.u32 2147483647, %v281_v10  ;;  %vm304_vm2 = vcmp.ge.f32.partialorder %v281_v10, 0.0 }
 0x137   : > { %v283_v13 = vmul.f32 0.3275911, %v282_v12  ;;  %v298_v17 = vsub.f32 0.0, %v282_v12 }
 0x139   : > { %v284_v14 = vadd.f32 1.0, %v283_v13  ;;  %v299_v20 = vmul.f32 %v298_v17, %v282_v12 }
 0x13b   : > { %521 = vrcp.f32 %v284_v14  ;;  %v300_v23 = vmul.f32 1.442695, %v299_v20 }
 0x13d   : > { %523 = vpow2.f32 %v300_v23 }
 0x145   : > { %v522_v15 = vpop.eup %521 }
 0x146   : > { %v286_v16 = vmul.f32 %v522_v15, %v284_v14 }
 0x147   : > { %v524_v31 = vpop.eup %523 }
 0x148   : > { %v287_v18 = vsub.f32 2.0, %v286_v16 }
 0x14a   : > { %v288_v19 = vmul.f32 %v522_v15, %v287_v18 }
 0x14c   : > { %v289_v21 = vmul.f32 1.0614054, %v288_v19 }
 0x14e   : > { %v290_v22 = vadd.f32 -1.4531521, %v289_v21 }
 0x150   : > { %v291_v24 = vmul.f32 %v290_v22, %v288_v19 }
 0x152   : > { %v292_v25 = vadd.f32 1.4214138, %v291_v24 }
 0x154   : > { %v293_v26 = vmul.f32 %v292_v25, %v288_v19 }
 0x156   : > { %v294_v27 = vadd.f32 -0.28449672, %v293_v26 }
 0x158   : > { %v295_v28 = vmul.f32 %v294_v27, %v288_v19 }
 0x15a   : > { %v296_v29 = vadd.f32 0.2548296, %v295_v28 }
 0x15c   : > { %v297_v30 = vmul.f32 %v296_v29, %v288_v19 }
 0x15e   : > { %v302_v32 = vmul.f32 %v524_v31, %v297_v30 }
 0x160   : > { %v303_v33 = vsub.f32 1.0, %v302_v32 }
 0x162   : > { %v305_v34 = vsub.f32 0.0, %v303_v33 }
 0x164   : > { %v306_v35 = vsel %vm304_vm2, %v303_v33, %v305_v34 }
 0x165   : > { %v307_v37 = vadd.f32 1.0, %v306_v35 }
 0x167   : > { %v308_v38 = vmul.f32 %v307_v37, %v280_v36 }
 0x169   : > { %v309_v39 = vmul.f32 %v308_v38, %v308_v38 }
 0x16b   : > { %v310_v40 = vsel %vm206_vm1, %v309_v39, 0.0 }
 0x16c   : > { %311 = vadd.xlane.f32.xlu0 %v310_v40 }
 0x1f9   : > { %v312_v41 = vpop.xlane.xlu0 %311 }
 0x1fa   : > { %v314_v42 = vmul.f32 0.03125, %v312_v41 }
 0x1fc   : > { %v315_v43 = vadd.f32 1e-06, %v314_v42 }
 0x1fe   : > { %525 = vrsqrt.f32 %v315_v43 }
 0x208   : > { %v526_v44 = vpop.eup %525 }
 0x209   : > { %v317_v46 = vmul.f32 %v526_v44, %v308_v38 }
 0x20b   : > { %v325_v47 = vmul.f32 %v432_v45, %v317_v46 }
 0x20d   : > { %326 = vst.msk [vmem:[%s200_s25] sm:$0xff] %vm206_vm1, %v325_v47 }
 0x20e   : > { %598 = shalt.err (!%p595_p7)
}
 0x20f   : > { %s599_s29 = scalar_lea.hbm %s846_s9, 128  ;;  %s603_s22 = scalar_lea.hbm %s894_s3, 256 }
 0x210   : > { %p600_p9 = scmp.ne.s32.totalorder %s846_s9, %s599_s29  ;;  %p604_p0 = scmp.lt.u32.totalorder %s846_s9, %s894_s3 }
 0x211   : > { %p605_p11 = scmp.lt.u32.totalorder %s603_s22, %s599_s29  ;;  %p607_p4 = scmp.lt.u32.totalorder %s599_s29, %s846_s9 }
 0x212   : > { %p601_p2 = pnand %p600_p9, %p776_p12 }
 0x213   : > { %p606_p1 = por %p605_p11, %p604_p0 }
 0x214   : > { %p602_p5 = pneg %p601_p2 }
 0x215   : > { %p608_p6 = por %p607_p4, %p606_p1 }
 0x217   : > { %p609_p8 = pnand %p608_p6, %p602_p5 }
 0x219   : > { %612 = shalt.err (!%p609_p8)
}
 0x21a   : > { %465 = dma.vmem_to_hbm [thread:$0]  (%p776_p12), %s848_s26, 128, %s846_s9, %s328_s10  }
 0x21b PF: > { %s353_s18 = sand.u32 1, %s643_s12   ;;  %p909_p10 = scmp.ne.s32.totalorder %s899_s19, 0 }
 0x21c   : > { %p910_p13 = scmp.ge.s32.totalorder %s655_s15, 2  ;;  %s354_s20 = scalar_lea.sflag [#allocation4], %s353_s18 }
 0x21e   : > { %p476_p3 = pnand %p910_p13, %p909_p10 }
 0x220   : > { %638 = dma.done.wait (!%p476_p3), %s354_s20, 128  }
 0x221   : > { %640 = vsyncadd (!%p476_p3), %s354_s20, 4294967168  ;;  %p17_p7 = scmp.ge.s32.totalorder %s741_s24, 4   ;;  %s911_s12 = smov %s647_s13 }
 0x222   : > { %s912_s13 = smov %s651_s14  ;;  %s913_s14 = smov %s772_s17 }
 0x223   : > { %s914_s15 = smov %s741_s24  ;;  %19 = sbr.rel (!%p17_p7) target bundleno = 6 (0x6), region = 81 }
 0x22a   :  { %359 = vsyncpa [#allocation3], 1 }
 0x22b   :  { %361 = vsyncpa [#allocation3 + $0x1], 1 }
 0x22c   :  { %362 = vsyncpa [#allocation6], 1 }
 0x22d   :  { %363 = vsyncpa [#allocation4], 1 }
 0x22e   :  { %365 = vsyncpa [#allocation4 + $0x1], 1 }

</bundles_post_ra>
